<compile_context>
chip_gen: v7x
topology: tpu7x:2x2x1
jax: 0.10.0
libtpu: 0.0.40
codegen_flags: <defaults>
</compile_context>

<pallas_src>
import functools

import jax
import jax.numpy as jnp
from jax.experimental import pallas as pl
from jax.experimental.pallas import tpu as pltpu

_MIB = 1024 * 1024


def _round_up(x, m):
    return ((x + m - 1) // m) * m


def _cdiv(a, b):
    return -(-a // b)


def _chip_info():
    """Chip-aware (vmem_limit_bytes, tiling_budget_bytes, num_tensorcores, mxu_k)."""
    kind = ""
    try:
        kind = (jax.devices()[0].device_kind or "").lower()
    except Exception:
        pass
    is_v7 = ("v7" in kind) or ("7x" in kind)
    big_vmem = (not is_v7) and any(t in kind for t in ("v2", "v3", "v4", "v5", "v6"))
    num_tc = 2 if is_v7 else 1
    # v5e MXU is 128x128; v6e/v7x are 256x256 (affects the fuse crossover).
    mxu_k = 128 if ("v5 lite" in kind or "v5e" in kind or "v5lite" in kind) else 256
    if big_vmem:                       # v5e/v6e: 128 MiB physical VMEM
        vmem_limit, budget = 96 * _MIB, 64 * _MIB
    else:                              # v7x (64 MiB / TC) or unknown: conservative
        vmem_limit, budget = 48 * _MIB, 24 * _MIB
    try:  # safety net: never budget above what the chip actually reports
        cap = int(getattr(pltpu.get_tpu_info(), "vmem_capacity_bytes", 0) or 0)
        if cap > 0:
            vmem_limit = min(vmem_limit, (cap * 3) // 4)
            budget = min(budget, (vmem_limit * 2) // 3)
    except Exception:
        pass
    return vmem_limit, budget, num_tc, mxu_k


def _dense_kernel(x_ref, w_ref, bias_ref, o_ref):
    # x: (TM, IN)  w: (IN, TN)  bias: (1, TN)  o: (TM, TN); f32 MXU accumulation.
    acc = jnp.dot(x_ref[...], w_ref[...], preferred_element_type=jnp.float32)
    o_ref[...] = (acc + bias_ref[...]).astype(o_ref.dtype)


def _lowrank_kernel(x_ref, a_ref, b_ref, bias_ref, o_ref):
    # x: (TM, IN)  a: (IN, R_pad)  b: (R_pad, TN)  bias: (1, TN)  o: (TM, TN)
    t = jnp.dot(x_ref[...], a_ref[...], preferred_element_type=jnp.float32)
    # Feed the second MXU push at the weight dtype rate (matters for bf16);
    # accumulation stays f32 via preferred_element_type.
    t = t.astype(b_ref.dtype)
    acc = jnp.dot(t, b_ref[...], preferred_element_type=jnp.float32)
    o_ref[...] = (acc + bias_ref[...]).astype(o_ref.dtype)


@functools.partial(
    jax.jit, static_argnames=("fuse", "compute_dtype", "single_buffer_weights"))
def _lowrank_impl(x, A, B, b, *, fuse, compute_dtype, single_buffer_weights):
    in_features, rank = A.shape
    rank_b, out_features = B.shape
    assert rank == rank_b
    lead = x.shape[:-1]
    M = 1
    for d in lead:
        M *= d

    out_dtype = x.dtype
    c_dtype = jnp.dtype(compute_dtype) if compute_dtype is not None else jnp.dtype(x.dtype)
    c_item = c_dtype.itemsize
    o_item = jnp.dtype(out_dtype).itemsize
    row_mult = 16 if min(c_item, o_item) == 2 else 8

    vmem_limit, budget, num_tc, mxu_k = _chip_info()

    # ---- output lane layout: pad to 128 only when large AND ragged ----
    if out_features < 128 or out_features % 128 == 0:
        out_eff = out_features            # full-dim block (masked vst only if <128)
    else:
        out_eff = _round_up(out_features, 128)
    r_pad = _round_up(rank, 128)

    if fuse is None:
        # Dense fused weight vs chained low-rank, measured in MXU passes:
        # K below the MXU's native K costs the same as K = mxu_k.
        fuse = in_features * out_eff <= max(r_pad, mxu_k) * (in_features + out_eff)

    x2 = x.reshape(M, in_features).astype(c_dtype)
    bias2 = b.reshape(1, out_features).astype(jnp.float32)
    if out_eff != out_features:
        bias2 = jnp.pad(bias2, ((0, 0), (0, out_eff - out_features)))

    if fuse:
        W = (A.astype(jnp.float32) @ B.astype(jnp.float32)).astype(c_dtype)
        if out_eff != out_features:
            W = jnp.pad(W, ((0, 0), (0, out_eff - out_features)))
        w_resident = in_features * out_eff * c_item
    else:
        A_p = jnp.pad(A.astype(c_dtype), ((0, 0), (0, r_pad - rank)))
        B_p = jnp.pad(B.astype(c_dtype),
                      ((0, r_pad - rank), (0, out_eff - out_features)))
        w_resident = (in_features * r_pad + r_pad * out_eff) * c_item
    bias_resident = out_eff * 4
    w_bufs = 1 if single_buffer_weights else 2

    # ---- OUT tiling only when the resident weights would not fit the budget ----
    if w_bufs * (w_resident + bias_resident) <= budget // 2 or out_eff < 256:
        tn, grid_n = out_eff, 1
    else:
        if fuse:
            per_col_w, fixed_w = in_features * c_item, 0
        else:
            per_col_w = r_pad * c_item
            fixed_w = w_bufs * in_features * r_pad * c_item        # A stays resident
        avail_w = max(budget // 2 - fixed_w, 2 * 128 * (per_col_w + 4))
        tn = max(128, (avail_w // (2 * (per_col_w + 4))) // 128 * 128)
        tn = min(tn, out_eff)
        grid_n = _cdiv(out_eff, tn)
    # TODO(synk): add a K/IN reduction grid axis (f32 accumulator + pl.when
    # init/finalize) once in_features itself is too large to keep resident.

    # ---- per-step VMEM accounting (includes f32 matmul intermediates) ----
    if grid_n == 1:
        w_vmem = w_bufs * (w_resident + bias_resident)
    elif fuse:
        w_vmem = 2 * (in_features * tn * c_item + tn * 4)
    else:
        w_vmem = (w_bufs * in_features * r_pad * c_item
                  + 2 * (r_pad * tn * c_item + tn * 4))
    per_row = 2 * in_features * c_item            # x tile, double-buffered
    per_row += 2 * tn * o_item                    # out tile, double-buffered
    per_row += 4 * tn                             # f32 (TM, TN) accumulator
    if not fuse:
        per_row += r_pad * (4 + c_item)           # f32 + cast (TM, R_pad) intermediates

    avail = max(budget - w_vmem, per_row * row_mult)
    tm_cap = 2048 if budget >= 48 * _MIB else 1024
    tm = max(row_mult, min(tm_cap, (avail // per_row) // row_mult * row_mult))
    tm = min(tm, _round_up(M, row_mult))
    grid_m = _cdiv(M, tm)
    # v7x: keep both TensorCores busy whenever each tile keeps >= 256 rows.
    if num_tc > 1 and grid_m < num_tc and M >= num_tc * 256:
        tm = _round_up(_cdiv(M, num_tc), row_mult)
        grid_m = _cdiv(M, tm)

    # ---- cost hint so XLA can schedule/overlap around the custom call ----
    x_bytes = M * in_features * c_item
    out_bytes = M * out_eff * o_item
    if fuse:
        flops = 2 * M * in_features * out_eff
        w_bytes = in_features * out_eff * c_item
    else:
        flops = 2 * M * (in_features * r_pad * grid_n + r_pad * out_eff)
        w_bytes = (in_features * r_pad + r_pad * out_eff) * c_item
    cost = pl.CostEstimate(flops=flops, transcendentals=0,
                           bytes_accessed=x_bytes + w_bytes + out_eff * 4 + out_bytes)

    def spec(shape, index_map, resident):
        if resident and single_buffer_weights:
            # Grid-invariant block: fetch once, keep a single VMEM buffer.
            return pl.BlockSpec(shape, index_map, pipeline_mode=pl.Buffered(1))
        return pl.BlockSpec(shape, index_map)

    x_spec = pl.BlockSpec((tm, in_features), lambda i, j: (i, 0))
    o_spec = pl.BlockSpec((tm, tn), lambda i, j: (i, j))
    bias_spec = spec((1, tn),
                     (lambda i, j: (0, 0)) if grid_n == 1 else (lambda i, j: (0, j)),
                     resident=(grid_n == 1))

    if fuse:
        w_spec = spec((in_features, tn),
                      (lambda i, j: (0, 0)) if grid_n == 1 else (lambda i, j: (0, j)),
                      resident=(grid_n == 1))
        kernel = _dense_kernel
        in_specs = [x_spec, w_spec, bias_spec]
        args = (x2, W, bias2)
    else:
        a_spec = spec((in_features, r_pad), lambda i, j: (0, 0), resident=True)
        b_spec = spec((r_pad, tn),
                      (lambda i, j: (0, 0)) if grid_n == 1 else (lambda i, j: (0, j)),
                      resident=(grid_n == 1))
        kernel = _lowrank_kernel
        in_specs = [x_spec, a_spec, b_spec, bias_spec]
        args = (x2, A_p, B_p, bias2)

    out2 = pl.pallas_call(
        kernel,
        out_shape=jax.ShapeDtypeStruct((M, out_eff), out_dtype),
        grid_spec=pltpu.PrefetchScalarGridSpec(
            num_scalar_prefetch=0,
            grid=(grid_m, grid_n),
            in_specs=in_specs,
            out_specs=o_spec),
        compiler_params=pltpu.CompilerParams(
            dimension_semantics=("parallel", "parallel"),
            vmem_limit_bytes=vmem_limit),
        cost_estimate=cost,
    )(*args)

    if out_eff != out_features:
        out2 = out2[:, :out_features]
    return out2.reshape(*lead, out_features)


def lowrank_forward(x, A, B, b, *, fuse=None, compute_dtype=None):
    """x: [..., in_features] -> [..., out_features], computing (x @ A) @ B + b."""
    try:
        return _lowrank_impl(x, A, B, b, fuse=fuse, compute_dtype=compute_dtype,
                             single_buffer_weights=True)
    except Exception:
        # Fallback if this jax build rejects single-buffering via pl.Buffered(1).
        return _lowrank_impl(x, A, B, b, fuse=fuse, compute_dtype=compute_dtype,
                             single_buffer_weights=False)


def init_params(key, in_features, out_features, rank):
    """Deterministic synthetic init mirroring the PyTorch module's shapes.

    kaiming_uniform_ on a 2-D tensor (fan_in = dim 1): U(-sqrt(6/fan_in), +sqrt(6/fan_in)).
    nn.init.uniform_ default: U(0, 1).
    """
    kA, kB, kb = jax.random.split(key, 3)
    boundA = (6.0 / rank) ** 0.5            # wA (in_features, rank) -> fan_in = rank
    boundB = (6.0 / out_features) ** 0.5    # wB (rank, out_features) -> fan_in = out_features
    A = jax.random.uniform(kA, (in_features, rank), jnp.float32, -boundA, boundA)
    B = jax.random.uniform(kB, (rank, out_features), jnp.float32, -boundB, boundB)
    b = jax.random.uniform(kb, (out_features,), jnp.float32, 0.0, 1.0)
    return A, B, b


if __name__ == "__main__":
    batch, seq = 2, 8
    in_features, rank, out_features = 32, 8, 64

    key = jax.random.PRNGKey(0)
    kx, kp = jax.random.split(key)
    x = jax.random.normal(kx, (batch, seq, in_features), jnp.float32)
    A, B, b = init_params(kp, in_features, out_features, rank)

    ref = (x @ A) @ B + b

    # Auto path (fuses A @ B into a dense weight for these tiny feature sizes).
    out = jax.block_until_ready(lowrank_forward(x, A, B, b))
    assert out.shape == (batch, seq, out_features)
    assert jnp.allclose(out, ref, atol=1e-4, rtol=1e-4), "fused path mismatch"

    # Explicit chained low-rank kernel (rank padded to 128 lanes, out unpadded).
    out_lr = jax.block_until_ready(lowrank_forward(x, A, B, b, fuse=False))
    assert jnp.allclose(out_lr, ref, atol=1e-4, rtol=1e-4), "low-rank path mismatch"

    # Ragged M: exercises the partial final block (no wrapper-side pad of x).
    x_r = jax.random.normal(kx, (3, 7, in_features), jnp.float32)
    out_r = jax.block_until_ready(lowrank_forward(x_r, A, B, b))
    ref_r = (x_r @ A) @ B + b
    assert out_r.shape == (3, 7, out_features)
    assert jnp.allclose(out_r, ref_r, atol=1e-4, rtol=1e-4), "ragged-M mismatch"

    # Optional bf16-compute mode (bf16 MXU pushes, f32 accumulation) — looser tol.
    out_bf = jax.block_until_ready(
        lowrank_forward(x, A, B, b, compute_dtype=jnp.bfloat16))
    assert out_bf.dtype == x.dtype
    assert jnp.allclose(out_bf, ref, atol=1e-1, rtol=1e-1), "bf16 path mismatch"

    print("KERNEL_OK")
</pallas_src>

<mosaic_0001>
module attributes {stable_mosaic.version = 11 : i64} {
  func.func @_dense_kernel(%arg0: i32, %arg1: i32, %arg2: memref<16x32xf32, #tpu.memory_space<vmem>>, %arg3: memref<32x64xf32, #tpu.memory_space<vmem>>, %arg4: memref<1x64xf32, #tpu.memory_space<vmem>>, %arg5: memref<16x64xf32, #tpu.memory_space<vmem>>) attributes {dimension_semantics = [#tpu.dimension_semantics<parallel>, #tpu.dimension_semantics<parallel>], iteration_bounds = array<i64: 1, 1>, scalar_prefetch = 0 : i64, scratch_operands = 0 : i64, tpu.core_type = #tpu.core_type<tc>, window_params = [{transform_indices = @transform_0, window_bounds = array<i64: 16, 32>}, {pipeline_mode = #tpu.pipeline_mode<synchronous>, transform_indices = @transform_1, window_bounds = array<i64: 32, 64>}, {pipeline_mode = #tpu.pipeline_mode<synchronous>, transform_indices = @transform_2, window_bounds = array<i64: 1, 64>}, {transform_indices = @transform_3, window_bounds = array<i64: 16, 64>}]} {
    %c0 = arith.constant 0 : index
    %c0_0 = arith.constant 0 : index
    %0 = vector.load %arg2[%c0, %c0_0] : memref<16x32xf32, #tpu.memory_space<vmem>>, vector<16x32xf32>
    %c0_1 = arith.constant 0 : index
    %c0_2 = arith.constant 0 : index
    %1 = vector.load %arg3[%c0_1, %c0_2] : memref<32x64xf32, #tpu.memory_space<vmem>>, vector<32x64xf32>
    %cst = arith.constant dense<0.000000e+00> : vector<16x64xf32>
    %2 = tpu.matmul %0, %1, %cst {dimension_numbers = #tpu.dot_dimension_numbers<[1], [0], [0], [1], [0, 0, 1, 1], [], []>} : vector<16x32xf32>, vector<32x64xf32>, vector<16x64xf32> -> vector<16x64xf32>
    %c0_3 = arith.constant 0 : index
    %c0_4 = arith.constant 0 : index
    %3 = vector.load %arg4[%c0_3, %c0_4] : memref<1x64xf32, #tpu.memory_space<vmem>>, vector<1x64xf32>
    %4 = vector.broadcast %3 : vector<1x64xf32> to vector<16x64xf32>
    %5 = arith.addf %2, %4 : vector<16x64xf32>
    %c0_5 = arith.constant 0 : index
    %c0_6 = arith.constant 0 : index
    %6 = vector.load %arg5[%c0_5, %c0_6] : memref<16x64xf32, #tpu.memory_space<vmem>>, vector<16x64xf32>
    tpu.vector_store %arg5[%c0_5, %c0_6], %5 {strides = array<i32>} : memref<16x64xf32, #tpu.memory_space<vmem>>, vector<16x64xf32>,
    return
  }
  func.func @transform_0(%arg0: i32, %arg1: i32) -> (i32, i32) {
    %c0_i32 = arith.constant 0 : i32
    %c0_i32_0 = arith.constant 0 : i32
    return %arg0, %c0_i32 : i32, i32
  }
  func.func @transform_1(%arg0: i32, %arg1: i32) -> (i32, i32) {
    %c0_i32 = arith.constant 0 : i32
    %c0_i32_0 = arith.constant 0 : i32
    %c0_i32_1 = arith.constant 0 : i32
    return %c0_i32, %c0_i32_0 : i32, i32
  }
  func.func @transform_2(%arg0: i32, %arg1: i32) -> (i32, i32) {
    %c0_i32 = arith.constant 0 : i32
    %c0_i32_0 = arith.constant 0 : i32
    %c0_i32_1 = arith.constant 0 : i32
    return %c0_i32, %c0_i32_0 : i32, i32
  }
  func.func @transform_3(%arg0: i32, %arg1: i32) -> (i32, i32) {
    %c0_i32 = arith.constant 0 : i32
    return %arg0, %arg1 : i32, i32
  }
}

module attributes {stable_mosaic.version = 11 : i64} {
  func.func @_dense_kernel(%arg0: i32, %arg1: i32, %arg2: memref<16x32xf32, #tpu.memory_space<vmem>>, %arg3: memref<32x64xf32, #tpu.memory_space<vmem>>, %arg4: memref<1x64xf32, #tpu.memory_space<vmem>>, %arg5: memref<16x64xf32, #tpu.memory_space<vmem>>) attributes {dimension_semantics = [#tpu.dimension_semantics<parallel>, #tpu.dimension_semantics<parallel>], iteration_bounds = array<i64: 1, 1>, scalar_prefetch = 0 : i64, scratch_operands = 0 : i64, tpu.core_type = #tpu.core_type<tc>, window_params = [{transform_indices = @transform_0, window_bounds = array<i64: 16, 32>}, {pipeline_mode = #tpu.pipeline_mode<synchronous>, transform_indices = @transform_1, window_bounds = array<i64: 32, 64>}, {pipeline_mode = #tpu.pipeline_mode<synchronous>, transform_indices = @transform_2, window_bounds = array<i64: 1, 64>}, {transform_indices = @transform_3, window_bounds = array<i64: 16, 64>}]} {
    %c0 = arith.constant 0 : index
    %c0_0 = arith.constant 0 : index
    %0 = vector.load %arg2[%c0, %c0_0] : memref<16x32xf32, #tpu.memory_space<vmem>>, vector<16x32xf32>
    %c0_1 = arith.constant 0 : index
    %c0_2 = arith.constant 0 : index
    %1 = vector.load %arg3[%c0_1, %c0_2] : memref<32x64xf32, #tpu.memory_space<vmem>>, vector<32x64xf32>
    %cst = arith.constant dense<0.000000e+00> : vector<16x64xf32>
    %2 = tpu.matmul %0, %1, %cst {dimension_numbers = #tpu.dot_dimension_numbers<[1], [0], [0], [1], [0, 0, 1, 1], [], []>} : vector<16x32xf32>, vector<32x64xf32>, vector<16x64xf32> -> vector<16x64xf32>
    %c0_3 = arith.constant 0 : index
    %c0_4 = arith.constant 0 : index
    %3 = vector.load %arg4[%c0_3, %c0_4] : memref<1x64xf32, #tpu.memory_space<vmem>>, vector<1x64xf32>
    %4 = vector.broadcast %3 : vector<1x64xf32> to vector<16x64xf32>
    %5 = arith.addf %2, %4 : vector<16x64xf32>
    %c0_5 = arith.constant 0 : index
    %c0_6 = arith.constant 0 : index
    %6 = vector.load %arg5[%c0_5, %c0_6] : memref<16x64xf32, #tpu.memory_space<vmem>>, vector<16x64xf32>
    tpu.vector_store %arg5[%c0_5, %c0_6], %5 {strides = array<i32>} : memref<16x64xf32, #tpu.memory_space<vmem>>, vector<16x64xf32>,
    return
  }
  func.func @transform_0(%arg0: i32, %arg1: i32) -> (i32, i32) {
    %c0_i32 = arith.constant 0 : i32
    %c0_i32_0 = arith.constant 0 : i32
    return %arg0, %c0_i32 : i32, i32
  }
  func.func @transform_1(%arg0: i32, %arg1: i32) -> (i32, i32) {
    %c0_i32 = arith.constant 0 : i32
    %c0_i32_0 = arith.constant 0 : i32
    %c0_i32_1 = arith.constant 0 : i32
    return %c0_i32, %c0_i32_0 : i32, i32
  }
  func.func @transform_2(%arg0: i32, %arg1: i32) -> (i32, i32) {
    %c0_i32 = arith.constant 0 : i32
    %c0_i32_0 = arith.constant 0 : i32
    %c0_i32_1 = arith.constant 0 : i32
    return %c0_i32, %c0_i32_0 : i32, i32
  }
  func.func @transform_3(%arg0: i32, %arg1: i32) -> (i32, i32) {
    %c0_i32 = arith.constant 0 : i32
    return %arg0, %arg1 : i32, i32
  }
}

</mosaic_0001>

<bundles_post_ra>
// kernel: _lowrank_impl.1
= control target key start
LH: loop header
LB: loop body
LE: loop exit
PB: predicated region body
PF: predicated region fallthrough
CT: control target
= control target key end

     0   :  { %vm28_vm0 = vcmask 261120   ;;  %s240_s0 = inlined_call_operand.vmem [shape: f32[16,32], index: 0, kind: input, shape index: {}]   ;;  %s241_s1 = inlined_call_operand.vmem [shape: f32[32,64], index: 1, kind: input, shape index: {}]   ;;  %s242_s2 = inlined_call_operand.vmem [shape: f32[1,64], index: 2, kind: input, shape index: {}]   ;;  %s243_s3 = inlined_call_operand.hbm [shape: f32[16,64], index: 3, kind: output, shape index: {}]  }
   0x1   :  { %v17_v0 = vld [vmem:[%s241_s1] sm:$0xff]  ;;  %v18_v1 = vld [vmem:[%s241_s1 + $0x8] sm:$0xff]  ;;  %v19_v2 = vld [vmem:[%s241_s1 + $0x10] sm:$0xff] }
   0x2   :  { %v149_v3 = vpack.c.bf16 %v18_v1, %v17_v0  ;;  %v20_v4 = vld [vmem:[%s241_s1 + $0x18] sm:$0xff]  ;;  %v15_v5 = vld [vmem:[%s240_s0] sm:$0xff] }
   0x3   :  { %v153_v6 = vpack.c.bf16 %v20_v4, %v19_v2  ;;  %146 = vmatprep.mubr.msk.f32.mxu0 %vm28_vm0, %v15_v5 }
   0x4   :  { %8 = vsyncpa [#allocation3], 0  ;;  %150 = vmatprep.subr.bf16.mxu0 %v149_v3  ;;  %v16_v7 = vld [vmem:[%s240_s0 + $0x8] sm:$0xff]  ;;  %v129_v8 = vld [vmem:[%s242_s2] ss:$0 sm:$0xff]  ;;  %s184_s1 = smov [#allocation2]  }
   0x5   :  { %152 = vmatpush3.bf16.msra.mxu0 %v149_v3  ;;  %s118_s26 = sshll.u32 %s184_s1, 4  ;;  %vm110_vm1 = vcmask 523264   ;;  %s119_s26 = int_to_ptr.vmem [resolvable:$true] %s118_s26 }
   0x6   :  { %154 = vmatprep.subr.bf16.mxu0 %v153_v6  ;;  %s160_s27 = scalar_lea.vmem %s119_s26, 256  ;;  %p165_p1 = scmp.lt.s32.totalorder %s119_s26, %s119_s26 }
   0x7   :  { %p161_p0 = scmp.ne.s32.totalorder %s119_s26, %s160_s27  ;;  %p166_p2 = scmp.lt.s32.totalorder %s160_s27, %s160_s27 }
   0x9   :  { %156 = vmatpush3.bf16.msra.mxu0 %v153_v6  ;;  %p167_p3 = por %p166_p2, %p165_p1 }
   0xb   :  { %p168_p4 = pnand %p167_p3, %p161_p0 }
   0xc   :  { %147 = vmatmul.mubr.msk.f32.vlgmr.msra.gmra.mrb[0].mxu0 %vm28_vm0, %v16_v7 }
  0xdf   :  { %v148_v9 = vpop.f32.mrb[0].mxu0 }
  0xe0   :  { %v107_v10 = vadd.f32 %v148_v9, %v129_v8  ;;  %v101_v11 = vpop.f32.mrb[1].mxu0 }
  0xe1   :  { %v102_v12 = vadd.f32 %v129_v8, %v101_v11 }
  0xe2   :  { %112 = vst.msk [vmem:[#allocation2 + $0x8] sm:$0xff] %vm110_vm1, %v107_v10 }
  0xe3   :  { %111 = vst.msk [vmem:[#allocation2] sm:$0xff] %vm110_vm1, %v102_v12 }
  0xe4   :  { %171 = shalt.err (!%p168_p4)
}
  0xe5   :  { %s172_s2 = scalar_lea.hbm %s243_s3, 256 }
  0xe6   :  { %p173_p5 = scmp.ne.s32.totalorder %s243_s3, %s172_s2  ;;  %p176_p6 = scmp.lt.u32.totalorder %s172_s2, %s243_s3 }
  0xe8   :  { %p178_p7 = pnand %p176_p6, %p173_p5 }
  0xea   :  { %181 = shalt.err (!%p178_p7)
}
  0xeb   :  { %s185_s6 = smov 128   ;;  %s186_s7 = smov 8  }
  0xec   :  { %124 = dma.vmem_to_hbm [thread:$0]  %s119_s26, 256, %s243_s3, [#allocation3], %s185_s6, %s185_s6, %s186_s7  }
  0xed   :  { %182 = dma.done.wait [#allocation3], 256  }
  0xee   :  { %183 = vsyncadd [#allocation3], 4294967040 }
  0xef   :  { %128 = vsyncpa [#allocation3], 1 }

// kernel: _lowrank_impl.1
= control target key start
LH: loop header
LB: loop body
LE: loop exit
PB: predicated region body
PF: predicated region fallthrough
CT: control target
= control target key end

     0   :  { %vm28_vm0 = vcmask 261120   ;;  %s240_s0 = inlined_call_operand.vmem [shape: f32[16,32], index: 0, kind: input, shape index: {}]   ;;  %s241_s1 = inlined_call_operand.vmem [shape: f32[32,64], index: 1, kind: input, shape index: {}]   ;;  %s242_s2 = inlined_call_operand.vmem [shape: f32[1,64], index: 2, kind: input, shape index: {}]   ;;  %s243_s3 = inlined_call_operand.hbm [shape: f32[16,64], index: 3, kind: output, shape index: {}]  }
   0x1   :  { %v17_v0 = vld [vmem:[%s241_s1] sm:$0xff]  ;;  %v18_v1 = vld [vmem:[%s241_s1 + $0x8] sm:$0xff]  ;;  %v19_v2 = vld [vmem:[%s241_s1 + $0x10] sm:$0xff] }
   0x2   :  { %v149_v3 = vpack.c.bf16 %v18_v1, %v17_v0  ;;  %v20_v4 = vld [vmem:[%s241_s1 + $0x18] sm:$0xff]  ;;  %v15_v5 = vld [vmem:[%s240_s0] sm:$0xff] }
   0x3   :  { %v153_v6 = vpack.c.bf16 %v20_v4, %v19_v2  ;;  %146 = vmatprep.mubr.msk.f32.mxu0 %vm28_vm0, %v15_v5 }
   0x4   :  { %8 = vsyncpa [#allocation3], 0  ;;  %150 = vmatprep.subr.bf16.mxu0 %v149_v3  ;;  %v16_v7 = vld [vmem:[%s240_s0 + $0x8] sm:$0xff]  ;;  %v129_v8 = vld [vmem:[%s242_s2] ss:$0 sm:$0xff]  ;;  %s184_s1 = smov [#allocation2]  }
   0x5   :  { %152 = vmatpush3.bf16.msra.mxu0 %v149_v3  ;;  %s118_s26 = sshll.u32 %s184_s1, 4  ;;  %vm110_vm1 = vcmask 523264   ;;  %s119_s26 = int_to_ptr.vmem [resolvable:$true] %s118_s26 }
   0x6   :  { %154 = vmatprep.subr.bf16.mxu0 %v153_v6  ;;  %s160_s27 = scalar_lea.vmem %s119_s26, 256  ;;  %p165_p1 = scmp.lt.s32.totalorder %s119_s26, %s119_s26 }
   0x7   :  { %p161_p0 = scmp.ne.s32.totalorder %s119_s26, %s160_s27  ;;  %p166_p2 = scmp.lt.s32.totalorder %s160_s27, %s160_s27 }
   0x9   :  { %156 = vmatpush3.bf16.msra.mxu0 %v153_v6  ;;  %p167_p3 = por %p166_p2, %p165_p1 }
   0xb   :  { %p168_p4 = pnand %p167_p3, %p161_p0 }
   0xc   :  { %147 = vmatmul.mubr.msk.f32.vlgmr.msra.gmra.mrb[0].mxu0 %vm28_vm0, %v16_v7 }
  0xdf   :  { %v148_v9 = vpop.f32.mrb[0].mxu0 }
  0xe0   :  { %v107_v10 = vadd.f32 %v148_v9, %v129_v8  ;;  %v101_v11 = vpop.f32.mrb[1].mxu0 }
  0xe1   :  { %v102_v12 = vadd.f32 %v129_v8, %v101_v11 }
  0xe2   :  { %112 = vst.msk [vmem:[#allocation2 + $0x8] sm:$0xff] %vm110_vm1, %v107_v10 }
  0xe3   :  { %111 = vst.msk [vmem:[#allocation2] sm:$0xff] %vm110_vm1, %v102_v12 }
  0xe4   :  { %171 = shalt.err (!%p168_p4)
}
  0xe5   :  { %s172_s2 = scalar_lea.hbm %s243_s3, 256 }
  0xe6   :  { %p173_p5 = scmp.ne.s32.totalorder %s243_s3, %s172_s2  ;;  %p176_p6 = scmp.lt.u32.totalorder %s172_s2, %s243_s3 }
  0xe8   :  { %p178_p7 = pnand %p176_p6, %p173_p5 }
  0xea   :  { %181 = shalt.err (!%p178_p7)
}
  0xeb   :  { %s185_s6 = smov 128   ;;  %s186_s7 = smov 8  }
  0xec   :  { %124 = dma.vmem_to_hbm [thread:$0]  %s119_s26, 256, %s243_s3, [#allocation3], %s185_s6, %s185_s6, %s186_s7  }
  0xed   :  { %182 = dma.done.wait [#allocation3], 256  }
  0xee   :  { %183 = vsyncadd [#allocation3], 4294967040 }
  0xef   :  { %128 = vsyncpa [#allocation3], 1 }

</bundles_post_ra>
